<compile_context>
chip_gen: v7x
topology: tpu7x:2x2x1
jax: 0.10.0
libtpu: 0.0.40
codegen_flags: <defaults>
</compile_context>

<pallas_src>
import functools

import jax
import jax.numpy as jnp
from jax.experimental import pallas as pl
from jax.experimental.pallas import tpu as pltpu

LANE = 128


def _round_up(x, m):
    return ((x + m - 1) // m) * m


def _min_sublane(dtype):
    # Minimum second-minor tile: (8,128) f32, (16,128) bf16, (32,128) int8/fp8.
    return max(8, 32 // jnp.dtype(dtype).itemsize)


@functools.lru_cache(maxsize=None)
def _vmem_budget_bytes():
    """Per-generation VMEM budget for the kernel working set (with headroom)."""
    try:
        cap = int(pltpu.get_tpu_info().vmem_capacity_bytes)
    except Exception:
        cap = 64 * 1024 * 1024          # conservative (v7x-sized) fallback
    # ~48 MiB on v7x (64 MiB VMEM), ~96 MiB on v5e/v6e (128 MiB VMEM).
    return min(cap * 3 // 4, 100 * 1024 * 1024)


def _largest_128_divisor(total, cap):
    """Largest multiple-of-128 divisor of `total` (a multiple of 128) <= cap."""
    q = total // LANE
    cap_q = max(1, cap // LANE)
    best = 1
    for d in range(1, q + 1):
        if q % d == 0 and d <= cap_q:
            best = d
    return best * LANE


# ----------------------------------------------------------------------------
# Kernels
# ----------------------------------------------------------------------------
def _linear_kernel_fused_k(x_ref, w_ref, b_ref, o_ref):
    """Whole reduction in one block: out = x @ w + b (no accumulator scratch)."""
    acc = jnp.dot(x_ref[...], w_ref[...], preferred_element_type=jnp.float32)
    o_ref[...] = (acc + b_ref[...]).astype(o_ref.dtype)


def _linear_kernel_tiled_k(x_ref, w_ref, b_ref, o_ref, acc_ref):
    """K-tiled reduction with an f32 VMEM accumulator carried across K."""
    k = pl.program_id(2)
    partial = jnp.dot(x_ref[...], w_ref[...], preferred_element_type=jnp.float32)

    @pl.when(k == 0)
    def _():                       # first K step assigns (no zero-init + add)
        acc_ref[...] = partial

    @pl.when(k > 0)
    def _():
        acc_ref[...] += partial

    @pl.when(k == pl.num_programs(2) - 1)
    def _():                       # bias added exactly once, on the last step
        o_ref[...] = (acc_ref[...] + b_ref[...]).astype(o_ref.dtype)


# ----------------------------------------------------------------------------
# One-time (init-time) parameter preparation
# ----------------------------------------------------------------------------
def prepare_decoder_params(weight, bias, *, param_dtype=None):
    """Pad to multiples of 128 and transpose PyTorch (out,in) -> (in,out).

    Returns:
      w_t:   (Kp, Np) weight.T, zero-padded (K in sublanes, N in lanes -> MXU
             friendly, no per-tile transposes inside the kernel).
      b_row: (1, Np) f32 bias row.
    Call ONCE at model init and reuse; do not re-run per forward call.
    """
    out_f, in_f = weight.shape
    assert bias.shape == (out_f,), "bias shape mismatch"
    if param_dtype is not None:
        weight = weight.astype(param_dtype)
    kp = _round_up(in_f, LANE)
    np_ = _round_up(out_f, LANE)
    w_t = jnp.pad(weight.T, ((0, kp - in_f), (0, np_ - out_f)))
    b_row = jnp.pad(bias.astype(jnp.float32), (0, np_ - out_f)).reshape(1, np_)
    return w_t, b_row


# ----------------------------------------------------------------------------
# Forward
# ----------------------------------------------------------------------------
def linear_forward_prepared(x, w_t, b_row, output_size, *,
                            tm=None, tn=None, tk=None):
    """out = x @ weight.T + bias using pre-prepared (padded/transposed) params."""
    orig_dtype = x.dtype
    lead = x.shape[:-1]
    in_f = x.shape[-1]
    x2 = x.reshape(-1, in_f)
    B = x2.shape[0]
    Kp, Np = w_t.shape
    assert Kp >= in_f and Kp % LANE == 0 and Np % LANE == 0
    assert Np >= output_size

    # bf16-weight path: matmul in the narrower dtype, accumulate in f32.
    compute_dtype = (w_t.dtype
                     if jnp.dtype(w_t.dtype).itemsize < jnp.dtype(x2.dtype).itemsize
                     else x2.dtype)
    out_dtype = orig_dtype
    x_bytes = jnp.dtype(compute_dtype).itemsize
    w_bytes = jnp.dtype(w_t.dtype).itemsize
    out_bytes = jnp.dtype(out_dtype).itemsize
    sub = max(_min_sublane(compute_dtype), _min_sublane(out_dtype))

    budget = _vmem_budget_bytes()
    tm_given = tm is not None

    # --- M tiling: one tile covering the whole batch whenever possible, so the
    #     weight is streamed from HBM exactly once.
    if tm is None:
        tm = min(_round_up(B, sub), 1024)
    Mp = _round_up(B, tm)
    gm = Mp // tm

    # --- N tiling (lane-dense, divides Np).
    if tn is None:
        tn = _largest_128_divisor(Np, 512)
        # v7x megacore: make sure a *parallel* grid axis has >= 2 steps.
        if gm * (Np // tn) < 2:
            if Np // LANE >= 2:                          # split N
                tn = _largest_128_divisor(Np, Np // 2)
            elif (not tm_given) and tm > sub and B >= 2 * sub:   # else split M
                tm = _round_up(tm // 2, sub)
                Mp = _round_up(B, tm)
                gm = Mp // tm
    gn = Np // tn

    # --- K tiling: keep the whole reduction in one block when VMEM allows.
    def working_set(tk_, w_bufs):
        return (2 * tm * tk_ * x_bytes            # x tiles (double-buffered)
                + w_bufs * tk_ * tn * w_bytes     # weight tiles
                + 2 * tn * 4                      # bias tiles
                + 2 * tm * tn * out_bytes         # output tiles
                + tm * tn * 4)                    # f32 accumulator (worst case)

    if tk is None:
        if working_set(Kp, 2) <= budget:
            tk = Kp
        else:
            fixed = 2 * tn * 4 + 2 * tm * tn * out_bytes + tm * tn * 4
            per_k = 2 * tm * x_bytes + 2 * tn * w_bytes
            tk = _largest_128_divisor(Kp, max(LANE, (budget - fixed) // per_k))
    gk = Kp // tk

    # --- pad / cast activations (cheap; the weight was padded once at init).
    xp = x2
    if Mp != B or Kp != in_f:
        xp = jnp.pad(xp, ((0, Mp - B), (0, Kp - in_f)))
    if xp.dtype != compute_dtype:
        xp = xp.astype(compute_dtype)

    compiler_params = pltpu.CompilerParams(
        dimension_semantics=(("parallel", "parallel") if gk == 1
                             else ("parallel", "parallel", "arbitrary")),
        vmem_limit_bytes=budget,
    )

    if gk == 1:
        # Single-K block: no accumulator scratch, bias fused into the store.
        out_p = pl.pallas_call(
            _linear_kernel_fused_k,
            out_shape=jax.ShapeDtypeStruct((Mp, Np), out_dtype),
            grid_spec=pltpu.PrefetchScalarGridSpec(
                num_scalar_prefetch=0,
                grid=(gm, gn),
                in_specs=[
                    pl.BlockSpec((tm, Kp), lambda i, j: (i, 0)),   # x
                    pl.BlockSpec((Kp, tn), lambda i, j: (0, j)),   # weight.T
                    pl.BlockSpec((1, tn), lambda i, j: (0, j)),    # bias
                ],
                out_specs=pl.BlockSpec((tm, tn), lambda i, j: (i, j)),
            ),
            compiler_params=compiler_params,
        )(xp, w_t, b_row)
    else:
        # Deep weight pipeline for the weight-stream-bound, deeply K-tiled
        # regime (largest win on v5e's lower HBM bandwidth).
        if gk >= 3 and working_set(tk, 3) <= budget:
            w_spec = pl.BlockSpec((tk, tn), lambda i, j, k: (k, j),
                                  pipeline_mode=pl.Buffered(3))
        else:
            w_spec = pl.BlockSpec((tk, tn), lambda i, j, k: (k, j))
        out_p = pl.pallas_call(
            _linear_kernel_tiled_k,
            out_shape=jax.ShapeDtypeStruct((Mp, Np), out_dtype),
            grid_spec=pltpu.PrefetchScalarGridSpec(
                num_scalar_prefetch=0,
                grid=(gm, gn, gk),                        # reduction axis last
                in_specs=[
                    pl.BlockSpec((tm, tk), lambda i, j, k: (i, k)),   # x
                    w_spec,                                           # weight.T
                    pl.BlockSpec((1, tn), lambda i, j, k: (0, j)),    # bias
                ],
                out_specs=pl.BlockSpec((tm, tn), lambda i, j, k: (i, j)),
                scratch_shapes=[pltpu.VMEM((tm, tn), jnp.float32)],
            ),
            compiler_params=compiler_params,
        )(xp, w_t, b_row)

    out = out_p[:B, :output_size]
    return out.reshape(*lead, output_size)


def one_layer_decoder_forward(x, weight, bias, **kwargs):
    """Drop-in equivalent of OneLayerDecoder.forward(x).

    NOTE: pads/transposes the weight per call for convenience only; in real use
    call `prepare_decoder_params` once at init and use `linear_forward_prepared`.
    """
    w_t, b_row = prepare_decoder_params(weight, bias)
    return linear_forward_prepared(x, w_t, b_row, weight.shape[0], **kwargs)


# predict_proba / predict: trivial elementwise / argmax ops, intentionally left
# as plain XLA ops on top of the kernel output (no Pallas needed).
def one_layer_decoder_predict_proba(x, weight, bias):
    out = one_layer_decoder_forward(x, weight, bias)
    if weight.shape[0] == 1:
        return jax.nn.sigmoid(out).reshape(-1)
    return jax.nn.softmax(out, axis=1)


def one_layer_decoder_predict(x, weight, bias):
    out = one_layer_decoder_predict_proba(x, weight, bias)
    if weight.shape[0] == 1:
        return out > 0.5
    return jnp.argmax(out, axis=1)


if __name__ == "__main__":
    key = jax.random.PRNGKey(0)

    def make_case(k, batch, in_f, out_f, dtype=jnp.float32):
        kx, kw, kb = jax.random.split(k, 3)
        bound = 1.0 / (in_f ** 0.5)
        w = jax.random.uniform(kw, (out_f, in_f), jnp.float32, -bound, bound)
        b = jax.random.uniform(kb, (out_f,), jnp.float32, -bound, bound)
        x = jax.random.normal(kx, (batch, in_f), dtype)
        return x, w, b

    # 1) Small case matching the module (batch, input_size) -> (batch, output_size);
    #    exercises the fused-K (no accumulator) path with init-time param prep.
    x, w, b = make_case(key, 8, 32, 16)
    w_t, b_row = prepare_decoder_params(w, b)          # one-time, init-style
    out = jax.block_until_ready(linear_forward_prepared(x, w_t, b_row, 16))
    ref = x @ w.T + b
    assert out.shape == (8, 16)
    assert jnp.allclose(out, ref, atol=1e-5, rtol=1e-5)

    # 2) Non-128-multiple In/Out (padding) + megacore N-split, still single-K.
    x2, w2, b2 = make_case(jax.random.PRNGKey(1), 32, 640, 160)
    o2 = jax.block_until_ready(one_layer_decoder_forward(x2, w2, b2))
    ref2 = x2 @ w2.T + b2
    assert o2.shape == (32, 160)
    assert jnp.allclose(o2, ref2, atol=1e-4, rtol=1e-4)

    # 3) Force the K-tiled accumulator kernel via tile overrides.
    x3, w3, b3 = make_case(jax.random.PRNGKey(2), 16, 256, 256)
    o3 = jax.block_until_ready(
        one_layer_decoder_forward(x3, w3, b3, tk=128, tn=128))
    ref3 = x3 @ w3.T + b3
    assert o3.shape == (16, 256)
    assert jnp.allclose(o3, ref3, atol=1e-4, rtol=1e-4)

    # 4) bf16 weight path (f32 MXU accumulation), loose tolerance for rounding.
    x4, w4, b4 = make_case(jax.random.PRNGKey(3), 16, 256, 128)
    w4_t, b4_row = prepare_decoder_params(w4, b4, param_dtype=jnp.bfloat16)
    o4 = jax.block_until_ready(linear_forward_prepared(x4, w4_t, b4_row, 128))
    ref4 = (x4.astype(jnp.bfloat16).astype(jnp.float32)
            @ w4.astype(jnp.bfloat16).astype(jnp.float32).T + b4)
    assert o4.shape == (16, 128)
    assert jnp.allclose(o4, ref4, atol=2e-2, rtol=2e-2)

    print("KERNEL_OK")
</pallas_src>

<mosaic_0001>
module attributes {stable_mosaic.version = 11 : i64} {
  func.func @_linear_kernel_fused_k(%arg0: i32, %arg1: i32, %arg2: memref<8x128xf32, #tpu.memory_space<vmem>>, %arg3: memref<128x128xf32, #tpu.memory_space<vmem>>, %arg4: memref<1x128xf32, #tpu.memory_space<vmem>>, %arg5: memref<8x128xf32, #tpu.memory_space<vmem>>) attributes {dimension_semantics = [#tpu.dimension_semantics<parallel>, #tpu.dimension_semantics<parallel>], iteration_bounds = array<i64: 1, 1>, scalar_prefetch = 0 : i64, scratch_operands = 0 : i64, tpu.core_type = #tpu.core_type<tc>, window_params = [{transform_indices = @transform_0, window_bounds = array<i64: 8, 128>}, {transform_indices = @transform_1, window_bounds = array<i64: 128, 128>}, {transform_indices = @transform_2, window_bounds = array<i64: 1, 128>}, {transform_indices = @transform_3, window_bounds = array<i64: 8, 128>}]} {
    %c0 = arith.constant 0 : index
    %c0_0 = arith.constant 0 : index
    %0 = vector.load %arg2[%c0, %c0_0] : memref<8x128xf32, #tpu.memory_space<vmem>>, vector<8x128xf32>
    %c0_1 = arith.constant 0 : index
    %c0_2 = arith.constant 0 : index
    %1 = vector.load %arg3[%c0_1, %c0_2] : memref<128x128xf32, #tpu.memory_space<vmem>>, vector<128x128xf32>
    %cst = arith.constant dense<0.000000e+00> : vector<8x128xf32>
    %2 = tpu.matmul %0, %1, %cst {dimension_numbers = #tpu.dot_dimension_numbers<[1], [0], [0], [1], [0, 0, 1, 1], [], []>} : vector<8x128xf32>, vector<128x128xf32>, vector<8x128xf32> -> vector<8x128xf32>
    %c0_3 = arith.constant 0 : index
    %c0_4 = arith.constant 0 : index
    %3 = vector.load %arg4[%c0_3, %c0_4] : memref<1x128xf32, #tpu.memory_space<vmem>>, vector<1x128xf32>
    %4 = vector.broadcast %3 : vector<1x128xf32> to vector<8x128xf32>
    %5 = arith.addf %2, %4 : vector<8x128xf32>
    %c0_5 = arith.constant 0 : index
    %c0_6 = arith.constant 0 : index
    %6 = vector.load %arg5[%c0_5, %c0_6] : memref<8x128xf32, #tpu.memory_space<vmem>>, vector<8x128xf32>
    tpu.vector_store %arg5[%c0_5, %c0_6], %5 {strides = array<i32>} : memref<8x128xf32, #tpu.memory_space<vmem>>, vector<8x128xf32>,
    return
  }
  func.func @transform_0(%arg0: i32, %arg1: i32) -> (i32, i32) {
    %c0_i32 = arith.constant 0 : i32
    %c0_i32_0 = arith.constant 0 : i32
    return %arg0, %c0_i32 : i32, i32
  }
  func.func @transform_1(%arg0: i32, %arg1: i32) -> (i32, i32) {
    %c0_i32 = arith.constant 0 : i32
    %c0_i32_0 = arith.constant 0 : i32
    return %c0_i32, %arg1 : i32, i32
  }
  func.func @transform_2(%arg0: i32, %arg1: i32) -> (i32, i32) {
    %c0_i32 = arith.constant 0 : i32
    %c0_i32_0 = arith.constant 0 : i32
    return %c0_i32, %arg1 : i32, i32
  }
  func.func @transform_3(%arg0: i32, %arg1: i32) -> (i32, i32) {
    %c0_i32 = arith.constant 0 : i32
    return %arg0, %arg1 : i32, i32
  }
}

</mosaic_0001>

<bundles_post_ra>
// kernel: tpu_custom_call.1
= control target key start
LH: loop header
LB: loop body
LE: loop exit
PB: predicated region body
PF: predicated region fallthrough
CT: control target
= control target key end

     0   :  { %8 = vsyncpa [#allocation3], 0  ;;  %s383_s0 = inlined_call_operand.hbm [shape: f32[8,128], index: 0, kind: input, shape index: {}]   ;;  %s384_s1 = inlined_call_operand.hbm [shape: f32[128,128], index: 1, kind: input, shape index: {}]   ;;  %s385_s2 = inlined_call_operand.vmem [shape: f32[1,128], index: 2, kind: input, shape index: {}]   ;;  %s386_s3 = inlined_call_operand.hbm [shape: f32[8,128], index: 3, kind: output, shape index: {}]  }
   0x1   :  { %9 = vsyncpa [#allocation6], 0 }
   0x2   :  { %10 = vsyncpa [#allocation4], 0  ;;  %s309_s12 = smov [#allocation2]   ;;  %s310_s14 = smov [#allocation5]  }
   0x3   :  { %s17_s13 = sshll.u32 %s309_s12, 4  ;;  %s26_s15 = sshll.u32 %s310_s14, 4  ;;  %s18_s13 = int_to_ptr.vmem [resolvable:$true] %s17_s13  ;;  %s337_s15 = int_to_ptr.vmem [resolvable:$true] %s26_s15 }
   0x4   :  { %s237_s18 = scalar_lea.hbm %s383_s0, 128 }
   0x5   :  { %p238_p0 = scmp.ne.s32.totalorder %s383_s0, %s237_s18  ;;  %p241_p1 = scmp.lt.u32.totalorder %s237_s18, %s383_s0 }
   0x7   :  { %p243_p2 = pnand %p241_p1, %p238_p0 }
   0x9   :  { %246 = shalt.err (!%p243_p2)
}
   0xa   :  { %s247_s23 = scalar_lea.vmem %s18_s13, 128  ;;  %p252_p4 = scmp.lt.s32.totalorder %s18_s13, %s18_s13 }
   0xb   :  { %p248_p3 = scmp.ne.s32.totalorder %s18_s13, %s247_s23  ;;  %p253_p5 = scmp.lt.s32.totalorder %s247_s23, %s247_s23 }
   0xd   :  { %p254_p6 = por %p253_p5, %p252_p4 }
   0xf   :  { %p255_p7 = pnand %p254_p6, %p248_p3 }
  0x11   :  { %258 = shalt.err (!%p255_p7)
}
  0x12   :  { %20 = dma.hbm_to_vmem [thread:$0]  %s383_s0, 128, %s18_s13, [#allocation3]  }
  0x13   :  { %s259_s28 = scalar_lea.hbm %s384_s1, 2048 }
  0x14   :  { %p260_p8 = scmp.ne.s32.totalorder %s384_s1, %s259_s28  ;;  %p263_p9 = scmp.lt.u32.totalorder %s259_s28, %s384_s1 }
  0x16   :  { %p265_p10 = pnand %p263_p9, %p260_p8 }
  0x18   :  { %268 = shalt.err (!%p265_p10)
}
  0x19   :  { %s269_s6 = scalar_lea.vmem %s337_s15, 2048  ;;  %p274_p12 = scmp.lt.s32.totalorder %s337_s15, %s337_s15 }
  0x1a   :  { %p270_p11 = scmp.ne.s32.totalorder %s337_s15, %s269_s6  ;;  %p275_p13 = scmp.lt.s32.totalorder %s269_s6, %s269_s6 }
  0x1c   :  { %p276_p0 = por %p275_p13, %p274_p12 }
  0x1e   :  { %p277_p1 = pnand %p276_p0, %p270_p11 }
  0x20   :  { %280 = shalt.err (!%p277_p1)
}
  0x21   :  { %s311_s0 = smov 128   ;;  %s312_s7 = smov 8  }
  0x22   :  { %32 = dma.hbm_to_vmem [thread:$0]  %s384_s1, 2048, %s337_s15, [#allocation6], %s311_s0, %s311_s0, %s312_s7  }
  0x23   :  { %303 = dma.done.wait [#allocation3], 128  }
  0x24   :  { %304 = vsyncadd [#allocation3], 4294967168 }
  0x25   :  { %305 = dma.done.wait [#allocation6], 2048  }
  0x26   :  { %306 = vsyncadd [#allocation6], 4294965248  ;;  %v313_v0 = vmov 0.0|0.0   ;;  %vm314_vm0 = vmmov 0   ;;  %v315_v1 = vmov 0.0   ;;  %v42_v2 = vld [vmem:[#allocation5] sm:$0xff] }
  0x27   :  { %205 = vmatprep.subr.bf16.mxu0 %v313_v0  ;;  %202 = vmatprep.mubr.msk.f32.mxu0 %vm314_vm0, %v315_v1  ;;  %v43_v3 = vld [vmem:[#allocation5 + $0x8] sm:$0xff]  ;;  %v44_v4 = vld [vmem:[#allocation5 + $0x10] sm:$0xff]  ;;  %v45_v6 = vld [vmem:[#allocation5 + $0x18] sm:$0xff]  ;;  %s316_s11 = smov [#allocation7]  }
  0x28   :  { %v206_v5 = vpack.c.bf16 %v43_v3, %v42_v2  ;;  %v209_v7 = vpack.c.bf16 %v45_v6, %v44_v4  ;;  %v46_v8 = vld [vmem:[#allocation5 + $0x20] sm:$0xff]  ;;  %v47_v9 = vld [vmem:[#allocation5 + $0x28] sm:$0xff]  ;;  %v48_v11 = vld [vmem:[#allocation5 + $0x30] sm:$0xff]  ;;  %s142_s12 = sshll.u32 %s316_s11, 4  ;;  %s143_s12 = int_to_ptr.vmem [resolvable:$true] %s142_s12 }
  0x29   :  { %v212_v10 = vpack.c.bf16 %v47_v9, %v46_v8  ;;  %v49_v12 = vld [vmem:[#allocation5 + $0x38] sm:$0xff]  ;;  %v50_v14 = vld [vmem:[#allocation5 + $0x40] sm:$0xff]  ;;  %v51_v15 = vld [vmem:[#allocation5 + $0x48] sm:$0xff]  ;;  %s281_s13 = scalar_lea.vmem %s143_s12, 128  ;;  %p286_p3 = scmp.lt.s32.totalorder %s143_s12, %s143_s12 }
  0x2a   :  { %207 = vmatpush3.bf16.msra.mxu0 %v206_v5  ;;  %v215_v13 = vpack.c.bf16 %v49_v12, %v48_v11  ;;  %v218_v16 = vpack.c.bf16 %v51_v15, %v50_v14  ;;  %v52_v17 = vld [vmem:[#allocation5 + $0x50] sm:$0xff]  ;;  %v53_v18 = vld [vmem:[#allocation5 + $0x58] sm:$0xff]  ;;  %v54_v20 = vld [vmem:[#allocation5 + $0x60] sm:$0xff]  ;;  %p282_p2 = scmp.ne.s32.totalorder %s143_s12, %s281_s13  ;;  %p287_p4 = scmp.lt.s32.totalorder %s281_s13, %s281_s13 }
  0x2b   :  { %208 = vmatprep.subr.bf16.mxu0 %v313_v0  ;;  %v221_v19 = vpack.c.bf16 %v53_v18, %v52_v17  ;;  %v55_v21 = vld [vmem:[#allocation5 + $0x68] sm:$0xff]  ;;  %v56_v23 = vld [vmem:[#allocation5 + $0x70] sm:$0xff]  ;;  %v57_v24 = vld [vmem:[#allocation5 + $0x78] sm:$0xff] }
  0x2c   :  { %v224_v22 = vpack.c.bf16 %v55_v21, %v54_v20  ;;  %v227_v25 = vpack.c.bf16 %v57_v24, %v56_v23  ;;  %v41_v26 = vld [vmem:[#allocation2] sm:$0xff]  ;;  %p288_p5 = por %p287_p4, %p286_p3 }
  0x2d   :  { %v152_v27 = vld [vmem:[%s385_s2] ss:$0 sm:$0xff] }
  0x2e   :  { %210 = vmatpush3.bf16.msra.mxu0 %v209_v7  ;;  %p289_p6 = pnand %p288_p5, %p282_p2 }
  0x2f   :  { %211 = vmatprep.subr.bf16.mxu0 %v313_v0 }
  0x32   :  { %213 = vmatpush3.bf16.msra.mxu0 %v212_v10 }
  0x33   :  { %214 = vmatprep.subr.bf16.mxu0 %v313_v0 }
  0x36   :  { %216 = vmatpush3.bf16.msra.mxu0 %v215_v13 }
  0x37   :  { %217 = vmatprep.subr.bf16.mxu0 %v313_v0 }
  0x3a   :  { %219 = vmatpush3.bf16.msra.mxu0 %v218_v16 }
  0x3b   :  { %220 = vmatprep.subr.bf16.mxu0 %v313_v0 }
  0x3e   :  { %222 = vmatpush3.bf16.msra.mxu0 %v221_v19 }
  0x3f   :  { %223 = vmatprep.subr.bf16.mxu0 %v313_v0 }
  0x42   :  { %225 = vmatpush3.bf16.msra.mxu0 %v224_v22 }
  0x43   :  { %226 = vmatprep.subr.bf16.mxu0 %v313_v0 }
  0x46   :  { %228 = vmatpush3.bf16.msra.mxu0 %v227_v25 }
  0x49   :  { %203 = vmatmul.mubr.f32.vlgmr.msra.gmra.mrb[0].mxu0 %v41_v26 }
 0x11c   :  { %v131_v28 = vpop.f32.mrb[0].mxu0 }
 0x11d   :  { %v132_v29 = vadd.f32 %v152_v27, %v131_v28  ;;  %v204_v30 = vpop.f32.mrb[1].mxu0 }
 0x11f   :  { %135 = vst [vmem:[#allocation7] sm:$0xff] %v132_v29 }
 0x120   :  { %292 = shalt.err (!%p289_p6)
}
 0x121   :  { %s293_s16 = scalar_lea.hbm %s386_s3, 128 }
 0x122   :  { %p294_p7 = scmp.ne.s32.totalorder %s386_s3, %s293_s16  ;;  %p297_p8 = scmp.lt.u32.totalorder %s293_s16, %s386_s3 }
 0x124   :  { %p299_p9 = pnand %p297_p8, %p294_p7 }
 0x126   :  { %302 = shalt.err (!%p299_p9)
}
 0x127   :  { %145 = dma.vmem_to_hbm [thread:$0]  %s143_s12, 128, %s386_s3, [#allocation4]  }
 0x128   :  { %307 = dma.done.wait [#allocation4], 128  }
 0x129   :  { %308 = vsyncadd [#allocation4], 4294967168 }
 0x12a   :  { %149 = vsyncpa [#allocation3], 1 }
 0x12b   :  { %150 = vsyncpa [#allocation6], 1 }
 0x12c   :  { %151 = vsyncpa [#allocation4], 1 }

</bundles_post_ra>
